<compile_context>
chip_gen: v7x
topology: tpu7x:2x2x1
jax: 0.10.0
libtpu: 0.0.40
codegen_flags: <defaults>
</compile_context>

<pallas_src>
import functools

import jax
import jax.numpy as jnp
from jax.experimental import pallas as pl
from jax.experimental.pallas import tpu as pltpu


def _ce_label_smooth_kernel(x_ref, t_ref, loss_ref,
                            m_ref, s_ref, sx_ref, tg_ref, *,
                            epsilon, num_classes, num_rows, block_k):
    i = pl.program_id(0)          # batch block ("parallel")
    j = pl.program_id(1)          # class chunk (reduction axis, last, "arbitrary")
    nj = pl.num_programs(1)

    @pl.when(j == 0)
    def _():
        m_ref[...] = jnp.full_like(m_ref, -jnp.inf)
        s_ref[...] = jnp.zeros_like(s_ref)
        sx_ref[...] = jnp.zeros_like(sx_ref)
        tg_ref[...] = jnp.zeros_like(tg_ref)

    x = x_ref[...].astype(jnp.float32)                     # (TB, TK)
    labels = t_ref[...]                                    # (TB, 1) int32
    tb, tk = x.shape

    # Global class id of each lane in this chunk; mask lane padding beyond the
    # true class count K (padded classes must not enter max/exp/sum or eps/K term).
    cls = j * block_k + jax.lax.broadcasted_iota(jnp.int32, (tb, tk), 1)
    valid = cls < num_classes

    x_m = jnp.where(valid, x, -jnp.inf)
    chunk_max = jnp.max(x_m, axis=1, keepdims=True)        # (TB, 1)
    m_old = m_ref[...]
    m_new = jnp.maximum(m_old, chunk_max)
    alpha = jnp.exp(m_old - m_new)                         # rescale old sum(exp)

    s_ref[...] = alpha * s_ref[...] + jnp.sum(jnp.exp(x_m - m_new),
                                              axis=1, keepdims=True)
    sx_ref[...] += jnp.sum(jnp.where(valid, x, 0.0), axis=1, keepdims=True)
    tg_ref[...] += jnp.sum(jnp.where(cls == labels, x, 0.0), axis=1, keepdims=True)
    m_ref[...] = m_new

    @pl.when(j == nj - 1)
    def _():
        lse = m_ref[...] + jnp.log(s_ref[...])
        row_loss = (lse
                    - (1.0 - epsilon) * tg_ref[...]
                    - (epsilon / num_classes) * sx_ref[...])   # (TB, 1)
        # Zero out sublane padding beyond the true batch size.
        row = i * tb + jax.lax.broadcasted_iota(jnp.int32, (tb, 1), 0)
        loss_ref[...] = jnp.where(row < num_rows, row_loss, 0.0)


def _round_up(x, m):
    return (x + m - 1) // m * m


def _pick_tile(padded_dim, candidates):
    for c in candidates:
        if padded_dim % c == 0:
            return c
    return candidates[-1]


def cross_entropy_label_smooth(inputs, targets, *, num_classes, epsilon=0.1):
    """inputs: (B, K) float logits (f32 or bf16), targets: (B,) int class ids -> scalar loss."""
    b, k = inputs.shape
    assert k == num_classes
    targets_2d = targets.astype(jnp.int32).reshape(b, 1)

    # Lane-pad classes to a multiple of 128, sublane-pad batch to a multiple of 8,
    # and pick the largest tile from a fixed menu that divides the padded dim
    # (big (8,128)-aligned blocks, no extra HBM traffic for common sizes).
    k_pad = _round_up(k, 128)
    b_pad = _round_up(b, 8)
    tk = _pick_tile(k_pad, (2048, 1024, 512, 256, 128))
    tb = _pick_tile(b_pad, (512, 256, 128, 64, 32, 16, 8))
    # Max block: (512, 2048) f32 = 4 MiB -> 8 MiB double-buffered; fits the
    # default scoped VMEM on v5e (16 MiB), v6e (32 MiB) and v7x (32 MiB).

    if k_pad != k or b_pad != b:
        inputs = jnp.pad(inputs, ((0, b_pad - b), (0, k_pad - k)))
    if b_pad != b:
        targets_2d = jnp.pad(targets_2d, ((0, b_pad - b), (0, 0)))

    grid = (b_pad // tb, k_pad // tk)

    kernel = functools.partial(
        _ce_label_smooth_kernel,
        epsilon=float(epsilon),
        num_classes=int(num_classes),   # true K for the eps/K term and masking
        num_rows=int(b),                # true B for row masking
        block_k=int(tk),
    )

    itemsize = jnp.dtype(inputs.dtype).itemsize
    per_row_loss = pl.pallas_call(
        kernel,
        out_shape=jax.ShapeDtypeStruct((b_pad, 1), jnp.float32),
        grid_spec=pltpu.PrefetchScalarGridSpec(
            num_scalar_prefetch=0,
            grid=grid,
            in_specs=[
                pl.BlockSpec((tb, tk), lambda i, j: (i, j)),   # logits tile
                pl.BlockSpec((tb, 1), lambda i, j: (i, 0)),    # labels (resident over j)
            ],
            out_specs=pl.BlockSpec((tb, 1), lambda i, j: (i, 0)),
            scratch_shapes=[pltpu.VMEM((tb, 1), jnp.float32)] * 4,  # m, s, sum(x), x[target]
        ),
        compiler_params=pltpu.CompilerParams(
            dimension_semantics=("parallel", "arbitrary")),
        cost_estimate=pl.CostEstimate(
            flops=5 * b_pad * k_pad,
            transcendentals=b_pad * k_pad,
            bytes_accessed=b_pad * k_pad * itemsize + b_pad * 8),
    )(inputs, targets_2d)

    # Padded rows were zeroed in-kernel; divide by the true batch size.
    return jnp.sum(per_row_loss) / jnp.float32(b)


def _reference(inputs, targets, *, num_classes, epsilon=0.1):
    log_probs = jax.nn.log_softmax(inputs.astype(jnp.float32), axis=1)
    onehot = jax.nn.one_hot(targets, num_classes, dtype=jnp.float32)
    smoothed = (1.0 - epsilon) * onehot + epsilon / num_classes
    return jnp.sum(jnp.mean(-smoothed * log_probs, axis=0))


if __name__ == "__main__":
    EPS = 0.1
    key = jax.random.PRNGKey(0)

    # Small, deterministic shapes; (6, 37) exercises row/lane padding masks,
    # (24, 300) exercises the multi-block online logsumexp (grid (3, 3)).
    for (B, K) in ((6, 37), (24, 300)):
        key, k_logits, k_labels = jax.random.split(key, 3)
        logits = jax.random.normal(k_logits, (B, K), dtype=jnp.float32)
        labels = jax.random.randint(k_labels, (B,), 0, K, dtype=jnp.int32)

        loss = cross_entropy_label_smooth(logits, labels, num_classes=K, epsilon=EPS)
        loss = jax.block_until_ready(loss)

        ref = _reference(logits, labels, num_classes=K, epsilon=EPS)
        assert jnp.allclose(loss, ref, rtol=1e-5, atol=1e-5), (B, K, loss, ref)

    print("KERNEL_OK")
</pallas_src>

<mosaic_0001>
module attributes {stable_mosaic.version = 11 : i64} {
  func.func @_ce_label_smooth_kernel(%arg0: i32, %arg1: i32, %arg2: memref<8x128xf32, #tpu.memory_space<vmem>>, %arg3: memref<8x1xi32, #tpu.memory_space<vmem>>, %arg4: memref<8x1xf32, #tpu.memory_space<vmem>>, %arg5: memref<8x1xf32, #tpu.memory_space<vmem>>, %arg6: memref<8x1xf32, #tpu.memory_space<vmem>>, %arg7: memref<8x1xf32, #tpu.memory_space<vmem>>, %arg8: memref<8x1xf32, #tpu.memory_space<vmem>>) attributes {dimension_semantics = [#tpu.dimension_semantics<parallel>, #tpu.dimension_semantics<arbitrary>], iteration_bounds = array<i64: 1, 1>, scalar_prefetch = 0 : i64, scratch_operands = 4 : i64, tpu.core_type = #tpu.core_type<tc>, window_params = [{transform_indices = @transform_0, window_bounds = array<i64: 8, 128>}, {transform_indices = @transform_1, window_bounds = array<i64: 8, 1>}, {transform_indices = @transform_2, window_bounds = array<i64: 8, 1>}]} {
    %c0_i32 = arith.constant 0 : i32
    %0 = arith.cmpi eq, %arg1, %c0_i32 : i32
    %1 = arith.extui %0 : i1 to i32
    %c0_i32_0 = arith.constant 0 : i32
    %2 = arith.cmpi ne, %1, %c0_i32_0 : i32
    scf.if %2 {
      %cst_28 = arith.constant 0xFF800000 : f32
      %48 = vector.broadcast %cst_28 : f32 to vector<8x1xf32>
      %c0_29 = arith.constant 0 : index
      %c0_30 = arith.constant 0 : index
      %49 = vector.load %arg5[%c0_29, %c0_30] : memref<8x1xf32, #tpu.memory_space<vmem>>, vector<8x1xf32>
      tpu.vector_store %arg5[%c0_29, %c0_30], %48 {strides = array<i32>} : memref<8x1xf32, #tpu.memory_space<vmem>>, vector<8x1xf32>,
      %cst_31 = arith.constant 0.000000e+00 : f32
      %50 = vector.broadcast %cst_31 : f32 to vector<8x1xf32>
      %c0_32 = arith.constant 0 : index
      %c0_33 = arith.constant 0 : index
      %51 = vector.load %arg6[%c0_32, %c0_33] : memref<8x1xf32, #tpu.memory_space<vmem>>, vector<8x1xf32>
      tpu.vector_store %arg6[%c0_32, %c0_33], %50 {strides = array<i32>} : memref<8x1xf32, #tpu.memory_space<vmem>>, vector<8x1xf32>,
      %cst_34 = arith.constant 0.000000e+00 : f32
      %52 = vector.broadcast %cst_34 : f32 to vector<8x1xf32>
      %c0_35 = arith.constant 0 : index
      %c0_36 = arith.constant 0 : index
      %53 = vector.load %arg7[%c0_35, %c0_36] : memref<8x1xf32, #tpu.memory_space<vmem>>, vector<8x1xf32>
      tpu.vector_store %arg7[%c0_35, %c0_36], %52 {strides = array<i32>} : memref<8x1xf32, #tpu.memory_space<vmem>>, vector<8x1xf32>,
      %cst_37 = arith.constant 0.000000e+00 : f32
      %54 = vector.broadcast %cst_37 : f32 to vector<8x1xf32>
      %c0_38 = arith.constant 0 : index
      %c0_39 = arith.constant 0 : index
      %55 = vector.load %arg8[%c0_38, %c0_39] : memref<8x1xf32, #tpu.memory_space<vmem>>, vector<8x1xf32>
      tpu.vector_store %arg8[%c0_38, %c0_39], %54 {strides = array<i32>} : memref<8x1xf32, #tpu.memory_space<vmem>>, vector<8x1xf32>,
    } else {
    }
    %c0 = arith.constant 0 : index
    %c0_1 = arith.constant 0 : index
    %3 = vector.load %arg2[%c0, %c0_1] : memref<8x128xf32, #tpu.memory_space<vmem>>, vector<8x128xf32>
    %c0_2 = arith.constant 0 : index
    %c0_3 = arith.constant 0 : index
    %4 = vector.load %arg3[%c0_2, %c0_3] : memref<8x1xi32, #tpu.memory_space<vmem>>, vector<8x1xi32>
    %c128_i32 = arith.constant 128 : i32
    %5 = arith.muli %arg1, %c128_i32 : i32
    %6 = tpu.iota {dimensions = array<i32: 1>} : vector<8x128xi32>
    %7 = vector.broadcast %5 : i32 to vector<8x128xi32>
    %8 = arith.addi %7, %6 : vector<8x128xi32>
    %c37_i32 = arith.constant 37 : i32
    %9 = vector.broadcast %c37_i32 : i32 to vector<8x128xi32>
    %10 = arith.cmpi slt, %8, %9 : vector<8x128xi32>
    %cst = arith.constant 0xFF800000 : f32
    %11 = vector.broadcast %cst : f32 to vector<8x128xf32>
    %12 = arith.select %10, %3, %11 : vector<8x128xi1>, vector<8x128xf32>
    %cst_4 = arith.constant dense<0xFF800000> : vector<8xf32>
    %13 = vector.multi_reduction <maximumf>, %12, %cst_4 [1] : vector<8x128xf32> to vector<8xf32>
    %14 = vector.shape_cast %13 : vector<8xf32> to vector<8x1xf32>
    %c0_5 = arith.constant 0 : index
    %c0_6 = arith.constant 0 : index
    %15 = vector.load %arg5[%c0_5, %c0_6] : memref<8x1xf32, #tpu.memory_space<vmem>>, vector<8x1xf32>
    %16 = arith.maximumf %15, %14 : vector<8x1xf32>
    %17 = arith.subf %15, %16 : vector<8x1xf32>
    %18 = math.exp %17 : vector<8x1xf32>
    %c0_7 = arith.constant 0 : index
    %c0_8 = arith.constant 0 : index
    %19 = vector.load %arg6[%c0_7, %c0_8] : memref<8x1xf32, #tpu.memory_space<vmem>>, vector<8x1xf32>
    %20 = arith.mulf %18, %19 : vector<8x1xf32>
    %21 = vector.broadcast %16 : vector<8x1xf32> to vector<8x128xf32>
    %22 = arith.subf %12, %21 : vector<8x128xf32>
    %23 = math.exp %22 : vector<8x128xf32>
    %cst_9 = arith.constant dense<0.000000e+00> : vector<8xf32>
    %24 = vector.multi_reduction <add>, %23, %cst_9 [1] : vector<8x128xf32> to vector<8xf32>
    %25 = vector.shape_cast %24 : vector<8xf32> to vector<8x1xf32>
    %26 = arith.addf %20, %25 : vector<8x1xf32>
    %c0_10 = arith.constant 0 : index
    %c0_11 = arith.constant 0 : index
    %27 = vector.load %arg6[%c0_10, %c0_11] : memref<8x1xf32, #tpu.memory_space<vmem>>, vector<8x1xf32>
    tpu.vector_store %arg6[%c0_10, %c0_11], %26 {strides = array<i32>} : memref<8x1xf32, #tpu.memory_space<vmem>>, vector<8x1xf32>,
    %c0_12 = arith.constant 0 : index
    %c0_13 = arith.constant 0 : index
    %28 = vector.load %arg7[%c0_12, %c0_13] : memref<8x1xf32, #tpu.memory_space<vmem>>, vector<8x1xf32>
    %cst_14 = arith.constant 0.000000e+00 : f32
    %29 = vector.broadcast %cst_14 : f32 to vector<8x128xf32>
    %30 = arith.select %10, %3, %29 : vector<8x128xi1>, vector<8x128xf32>
    %cst_15 = arith.constant dense<0.000000e+00> : vector<8xf32>
    %31 = vector.multi_reduction <add>, %30, %cst_15 [1] : vector<8x128xf32> to vector<8xf32>
    %32 = vector.shape_cast %31 : vector<8xf32> to vector<8x1xf32>
    %33 = arith.addf %28, %32 : vector<8x1xf32>
    %c0_16 = arith.constant 0 : index
    %c0_17 = arith.constant 0 : index
    %34 = vector.load %arg7[%c0_16, %c0_17] : memref<8x1xf32, #tpu.memory_space<vmem>>, vector<8x1xf32>
    tpu.vector_store %arg7[%c0_16, %c0_17], %33 {strides = array<i32>} : memref<8x1xf32, #tpu.memory_space<vmem>>, vector<8x1xf32>,
    %c0_18 = arith.constant 0 : index
    %c0_19 = arith.constant 0 : index
    %35 = vector.load %arg8[%c0_18, %c0_19] : memref<8x1xf32, #tpu.memory_space<vmem>>, vector<8x1xf32>
    %36 = vector.broadcast %4 : vector<8x1xi32> to vector<8x128xi32>
    %37 = arith.cmpi eq, %8, %36 : vector<8x128xi32>
    %cst_20 = arith.constant 0.000000e+00 : f32
    %38 = vector.broadcast %cst_20 : f32 to vector<8x128xf32>
    %39 = arith.select %37, %3, %38 : vector<8x128xi1>, vector<8x128xf32>
    %cst_21 = arith.constant dense<0.000000e+00> : vector<8xf32>
    %40 = vector.multi_reduction <add>, %39, %cst_21 [1] : vector<8x128xf32> to vector<8xf32>
    %41 = vector.shape_cast %40 : vector<8xf32> to vector<8x1xf32>
    %42 = arith.addf %35, %41 : vector<8x1xf32>
    %c0_22 = arith.constant 0 : index
    %c0_23 = arith.constant 0 : index
    %43 = vector.load %arg8[%c0_22, %c0_23] : memref<8x1xf32, #tpu.memory_space<vmem>>, vector<8x1xf32>
    tpu.vector_store %arg8[%c0_22, %c0_23], %42 {strides = array<i32>} : memref<8x1xf32, #tpu.memory_space<vmem>>, vector<8x1xf32>,
    %c0_24 = arith.constant 0 : index
    %c0_25 = arith.constant 0 : index
    %44 = vector.load %arg5[%c0_24, %c0_25] : memref<8x1xf32, #tpu.memory_space<vmem>>, vector<8x1xf32>
    tpu.vector_store %arg5[%c0_24, %c0_25], %16 {strides = array<i32>} : memref<8x1xf32, #tpu.memory_space<vmem>>, vector<8x1xf32>,
    %c0_i32_26 = arith.constant 0 : i32
    %45 = arith.cmpi eq, %arg1, %c0_i32_26 : i32
    %46 = arith.extui %45 : i1 to i32
    %c0_i32_27 = arith.constant 0 : i32
    %47 = arith.cmpi ne, %46, %c0_i32_27 : i32
    scf.if %47 {
      %c0_28 = arith.constant 0 : index
      %c0_29 = arith.constant 0 : index
      %48 = vector.load %arg5[%c0_28, %c0_29] : memref<8x1xf32, #tpu.memory_space<vmem>>, vector<8x1xf32>
      %c0_30 = arith.constant 0 : index
      %c0_31 = arith.constant 0 : index
      %49 = vector.load %arg6[%c0_30, %c0_31] : memref<8x1xf32, #tpu.memory_space<vmem>>, vector<8x1xf32>
      %50 = math.log %49 : vector<8x1xf32>
      %51 = arith.addf %48, %50 : vector<8x1xf32>
      %c0_32 = arith.constant 0 : index
      %c0_33 = arith.constant 0 : index
      %52 = vector.load %arg8[%c0_32, %c0_33] : memref<8x1xf32, #tpu.memory_space<vmem>>, vector<8x1xf32>
      %cst_34 = arith.constant 0.899999976 : f32
      %53 = vector.broadcast %cst_34 : f32 to vector<8x1xf32>
      %54 = arith.mulf %53, %52 : vector<8x1xf32>
      %55 = arith.subf %51, %54 : vector<8x1xf32>
      %c0_35 = arith.constant 0 : index
      %c0_36 = arith.constant 0 : index
      %56 = vector.load %arg7[%c0_35, %c0_36] : memref<8x1xf32, #tpu.memory_space<vmem>>, vector<8x1xf32>
      %cst_37 = arith.constant 0.00270270277 : f32
      %57 = vector.broadcast %cst_37 : f32 to vector<8x1xf32>
      %58 = arith.mulf %57, %56 : vector<8x1xf32>
      %59 = arith.subf %55, %58 : vector<8x1xf32>
      %c8_i32 = arith.constant 8 : i32
      %60 = arith.muli %arg0, %c8_i32 : i32
      %61 = tpu.iota {dimensions = array<i32: 0>} : vector<8x1xi32>
      %62 = vector.broadcast %60 : i32 to vector<8x1xi32>
      %63 = arith.addi %62, %61 : vector<8x1xi32>
      %c6_i32 = arith.constant 6 : i32
      %64 = vector.broadcast %c6_i32 : i32 to vector<8x1xi32>
      %65 = arith.cmpi slt, %63, %64 : vector<8x1xi32>
      %cst_38 = arith.constant 0.000000e+00 : f32
      %66 = vector.broadcast %cst_38 : f32 to vector<8x1xf32>
      %67 = arith.select %65, %59, %66 : vector<8x1xi1>, vector<8x1xf32>
      %c0_39 = arith.constant 0 : index
      %c0_40 = arith.constant 0 : index
      %68 = vector.load %arg4[%c0_39, %c0_40] : memref<8x1xf32, #tpu.memory_space<vmem>>, vector<8x1xf32>
      tpu.vector_store %arg4[%c0_39, %c0_40], %67 {strides = array<i32>} : memref<8x1xf32, #tpu.memory_space<vmem>>, vector<8x1xf32>,
    } else {
    }
    return
  }
  func.func @transform_0(%arg0: i32, %arg1: i32) -> (i32, i32) {
    %c0_i32 = arith.constant 0 : i32
    return %arg0, %arg1 : i32, i32
  }
  func.func @transform_1(%arg0: i32, %arg1: i32) -> (i32, i32) {
    %c0_i32 = arith.constant 0 : i32
    %c0_i32_0 = arith.constant 0 : i32
    return %arg0, %c0_i32 : i32, i32
  }
  func.func @transform_2(%arg0: i32, %arg1: i32) -> (i32, i32) {
    %c0_i32 = arith.constant 0 : i32
    %c0_i32_0 = arith.constant 0 : i32
    return %arg0, %c0_i32 : i32, i32
  }
}

</mosaic_0001>

<bundles_post_ra>
// kernel: tpu_custom_call.1
= control target key start
LH: loop header
LB: loop body
LE: loop exit
PB: predicated region body
PF: predicated region fallthrough
CT: control target
= control target key end

     0   :  { %v23_v0 = vlaneseq  ;;  %vm15_vm0 = vcmask 7168   ;;  %v105_v1 = vmov -inf   ;;  %v106_v5 = vmov 0   ;;  %s143_s0 = inlined_call_operand.vmem [shape: f32[8,128], index: 0, kind: input, shape index: {}]   ;;  %s144_s1 = inlined_call_operand.vmem [shape: s32[8,1], index: 1, kind: input, shape index: {}]   ;;  %s145_s2 = inlined_call_operand.vmem [shape: f32[8,1], index: 2, kind: output, shape index: {}]  }
   0x1   :  { %16 = vst.msk [vmem:[#allocation2] sm:$0xff] %vm15_vm0, %v105_v1  ;;  %v20_v2 = vld [vmem:[%s143_s0] sm:$0xff]  ;;  %97 = vset.pattern.permute.xlu0 %v106_v5  ;;  %98 = vset.pattern.permute.xlu1 %v106_v5  ;;  %v107_v6 = vmov 0.0  }
   0x2   :  { %v24_v3 = vand.u32 127, %v23_v0  ;;  %17 = vst.msk [vmem:[#allocation3] sm:$0xff] %vm15_vm0, %v107_v6  ;;  %18 = vst.msk [vmem:[#allocation4] sm:$0xff] %vm15_vm0, %v107_v6  ;;  %v21_v7 = vld [vmem:[%s144_s1] sm:$0xff]  ;;  %v84_v36 = vshrl.u32 %v23_v0, 7 }
   0x3   :  { %19 = vst.msk [vmem:[#allocation5] sm:$0xff] %vm15_vm0, %v107_v6  ;;  %59 = vperm.xlu1 %98, %v21_v7  }
   0x4   :  { %vm27_vm1 = vcmp.lt.s32.totalorder %v24_v3, 37  ;;  %vm87_vm3 = vcmp.lt.s32.totalorder %v84_v36, 6 }
   0x5   :  { %v28_v4 = vsel %vm27_vm1, %v20_v2, -inf  ;;  %v52_v18 = vsel %vm27_vm1, %v20_v2, 0.0 }
   0x6   :  { %29 = vmax.xlane.f32.xlu0 %v28_v4 }
   0x8   :  { %v31_v8 = vld [vmem:[#allocation2] sm:$0xff] }
   0x9   :  { %v36_v21 = vld [vmem:[#allocation3] sm:$0xff]  ;;  %v51_v28 = vld [vmem:[#allocation4] sm:$0xff] }
   0xa   :  { %v57_v25 = vld [vmem:[#allocation5] sm:$0xff] }
  0x82   :  { %v60_v15 = vpop.permute.xlu1 %59 }
  0x83   :  { %vm61_vm2 = vcmp.eq.s32.totalorder %v24_v3, %v60_v15 }
  0x84   :  { %v62_v17 = vsel %vm61_vm2, %v20_v2, 0.0 }
  0x93   :  { %v30_v9 = vpop.xlane.xlu0 %29 }
  0x94   :  { %v32_v10 = vmax.f32 %v31_v8, %v30_v9 }
  0x96   :  { %v33_v11 = vsub.f32 %v31_v8, %v32_v10  ;;  %67 = vst.msk [vmem:[#allocation2] sm:$0xff] %vm15_vm0, %v32_v10  ;;  %40 = vperm.xlu0 %97, %v32_v10  }
  0x98   :  { %v34_v19 = vmul.f32 1.442695, %v33_v11 }
  0x9d   :  { %v71_v37 = vld [vmem:[#allocation2] sm:$0xff] }
 0x115   :  { %v41_v12 = vpop.permute.xlu0 %40 }
 0x116   :  { %v43_v13 = vsub.f32 %v28_v4, %v41_v12 }
 0x118   :  { %v44_v14 = vmul.f32 1.442695, %v43_v13 }
 0x11a   :  { %99 = vpow2.f32 %v44_v14 }
 0x11b   :  { %101 = vpow2.f32 %v34_v19 }
 0x124   :  { %v100_v16 = vpop.eup %99 }
 0x125   :  { %46 = vadd.xlane.f32.xlu1 %v100_v16  ;;  %v102_v20 = vpop.eup %101 }
 0x126   :  { %v37_v22 = vmul.f32 %v102_v20, %v36_v21 }
 0x129   :  { %63 = vadd.xlane.f32.xlu1 %v62_v17 }
 0x12d   :  { %53 = vadd.xlane.f32.xlu1 %v52_v18 }
 0x1b2   :  { %v47_v23 = vpop.xlane.xlu1 %46 }
 0x1b3   :  { %v48_v24 = vadd.f32 %v47_v23, %v37_v22 }
 0x1b5   :  { %50 = vst.msk [vmem:[#allocation3] sm:$0xff] %vm15_vm0, %v48_v24 }
 0x1b6   :  { %v64_v26 = vpop.xlane.xlu1 %63 }
 0x1b7   :  { %v65_v27 = vadd.f32 %v64_v26, %v57_v25 }
 0x1b9   :  { %66 = vst.msk [vmem:[#allocation5] sm:$0xff] %vm15_vm0, %v65_v27 }
 0x1ba   :  { %v54_v29 = vpop.xlane.xlu1 %53 }
 0x1bb   :  { %v55_v30 = vadd.f32 %v54_v29, %v51_v28 }
 0x1bc   :  { %v72_v31 = vld [vmem:[#allocation3] sm:$0xff] }
 0x1bd   :  { %103 = vlog2.f32 %v72_v31  ;;  %56 = vst.msk [vmem:[#allocation4] sm:$0xff] %vm15_vm0, %v55_v30 }
 0x1c0   :  { %v76_v33 = vld [vmem:[#allocation5] sm:$0xff] }
 0x1c1   :  { %v77_v39 = vmul.f32 0.9, %v76_v33 }
 0x1c4   :  { %v79_v34 = vld [vmem:[#allocation4] sm:$0xff] }
 0x1c5   :  { %v80_v40 = vmul.f32 0.0027027028, %v79_v34 }
 0x1c7   :  { %v104_v32 = vpop.eup %103 }
 0x1c8   :  { %v74_v35 = vmul.f32 0.6931472, %v104_v32 }
 0x1ca   :  { %v75_v38 = vadd.f32 %v74_v35, %v71_v37 }
 0x1cc   :  { %v78_v41 = vsub.f32 %v75_v38, %v77_v39 }
 0x1ce   :  { %v81_v42 = vsub.f32 %v78_v41, %v80_v40 }
 0x1d0   :  { %v88_v43 = vsel %vm87_vm3, %v81_v42, 0.0 }
 0x1d1   :  { %89 = vst.msk [vmem:[%s145_s2] sm:$0xff] %vm15_vm0, %v88_v43 }

</bundles_post_ra>
